<compile_context>
chip_gen: v7x
topology: tpu7x:2x2x1
jax: 0.10.0
libtpu: 0.0.40
codegen_flags: <defaults>
</compile_context>

<pallas_src>
import functools

import jax
import jax.numpy as jnp
from jax import lax
from jax.experimental import pallas as pl
from jax.experimental.pallas import tpu as pltpu


# ----------------------------------------------------------------------------
# small helpers
# ----------------------------------------------------------------------------

def _round_up(x, m):
    return ((x + m - 1) // m) * m


def _vmem_limit(*tile_bytes):
    # 2 pipeline buffers per input + scratch + headroom; clamp to a value that is
    # safe on v5e (16 MiB scoped default) through v7x (64 MiB physical).
    need = 3 * sum(tile_bytes) + (4 << 20)
    return int(min(32 << 20, max(8 << 20, need)))


def _compiler_params(n_axes, *tile_bytes):
    return pltpu.CompilerParams(
        dimension_semantics=("arbitrary",) * n_axes,
        vmem_limit_bytes=_vmem_limit(*tile_bytes))


def _sigmoid_and_focal(x, t, alpha, gamma):
    """Per-element sigmoid prob + focal loss sharing one exp(-|x|) (single EUP op
    feeds both the sigmoid and the stable BCE softplus term)."""
    e = jnp.exp(-jnp.abs(x))
    inv = pl.reciprocal(1.0 + e, approx=True)
    prob = jnp.where(x >= 0, inv, e * inv)                     # sigmoid(x)
    ce = jnp.maximum(x, 0.0) - x * t + jnp.log1p(e)            # BCE-with-logits
    p_t = prob * t + (1.0 - prob) * (1.0 - t)
    one_m = 1.0 - p_t
    mod = one_m * one_m if gamma == 2 else one_m ** gamma
    loss = ce * mod
    if alpha >= 0:
        loss = (alpha * t + (1.0 - alpha) * (1.0 - t)) * loss
    return prob, loss


# ----------------------------------------------------------------------------
# Kernel 1: classification sigmoid-focal loss, batched over decoder levels
#   logits  [L, R_pad, C_pad]   (R = B*Q rows, C padded to 128 lanes)
#   classes [L, R_pad, 1] int32 (in-kernel one-hot)
#   out     [1, 128] f32        (lane l = focal sum of level l)
# ----------------------------------------------------------------------------

def _focal_ce_kernel(logits_ref, cls_ref, out_ref, acc_ref,
                     *, alpha, gamma, n_classes, n_rows, tr):
    lvl = pl.program_id(0)
    rt = pl.program_id(1)

    @pl.when(jnp.logical_and(lvl == 0, rt == 0))
    def _init_out():
        out_ref[...] = jnp.zeros_like(out_ref)

    @pl.when(rt == 0)
    def _init_acc():
        acc_ref[...] = jnp.zeros_like(acc_ref)

    x = logits_ref[...].astype(jnp.float32)                 # (TR, C_pad)
    cls = cls_ref[...]                                      # (TR, 1) int32
    col = lax.broadcasted_iota(jnp.int32, x.shape, 1)
    row = lax.broadcasted_iota(jnp.int32, x.shape, 0) + rt * tr

    # in-kernel one-hot over the real C classes (no-object class -> all zeros)
    t = jnp.where(jnp.logical_and(col == cls, col < n_classes), 1.0, 0.0)
    valid = jnp.logical_and(row < n_rows, col < n_classes)

    _, loss = _sigmoid_and_focal(x, t, alpha, gamma)
    acc_ref[...] = acc_ref[...] + jnp.sum(jnp.where(valid, loss, 0.0))

    @pl.when(rt == pl.num_programs(1) - 1)
    def _finalize():
        lane = lax.broadcasted_iota(jnp.int32, out_ref.shape, 1)
        out_ref[...] = jnp.where(lane == lvl, acc_ref[...], out_ref[...])


def batched_focal_ce_sums(logits_levels, cls_levels, alpha=0.25, gamma=2.0):
    """logits_levels [L, R, C] f32, cls_levels [L, R] int32 -> per-level focal sums [L]."""
    L, R, C = logits_levels.shape
    c_pad = _round_up(C, 128)
    tr = min(512, _round_up(R, 8))
    r_pad = _round_up(R, tr)
    l_pad = 128

    logits_p = logits_levels
    if (r_pad, c_pad) != (R, C):
        logits_p = jnp.pad(logits_levels, ((0, 0), (0, r_pad - R), (0, c_pad - C)))
    cls_p = cls_levels
    if r_pad != R:
        cls_p = jnp.pad(cls_levels, ((0, 0), (0, r_pad - R)), constant_values=C)
    cls_p = cls_p[..., None]                                 # [L, R_pad, 1]

    tile_bytes = tr * c_pad * 4
    kern = functools.partial(_focal_ce_kernel, alpha=alpha, gamma=gamma,
                             n_classes=C, n_rows=R, tr=tr)
    out = pl.pallas_call(
        kern,
        out_shape=jax.ShapeDtypeStruct((1, l_pad), jnp.float32),
        grid=(L, r_pad // tr),
        in_specs=[pl.BlockSpec((None, tr, c_pad), lambda l, r: (l, r, 0)),
                  pl.BlockSpec((None, tr, 1), lambda l, r: (l, r, 0))],
        out_specs=pl.BlockSpec((1, l_pad), lambda l, r: (0, 0)),
        scratch_shapes=[pltpu.VMEM((1, 1), jnp.float32)],
        compiler_params=_compiler_params(2, tile_bytes, tr * 4),
    )(logits_p, cls_p)
    return out[0, :L]


# ----------------------------------------------------------------------------
# Kernel 2: fused mask sigmoid-focal + dice loss
#   src/tgt [M, HW_pad]  tiled along the spatial (lane) axis
#   out     [1, 128] f32 (lane 0 = focal sum, lane 1 = dice sum over rows)
# ----------------------------------------------------------------------------

def _mask_losses_kernel(src_ref, tgt_ref, out_ref, facc_ref, nacc_ref, dacc_ref,
                        *, alpha, gamma, hw, tc):
    ct = pl.program_id(0)

    @pl.when(ct == 0)
    def _init():
        facc_ref[...] = jnp.zeros_like(facc_ref)
        nacc_ref[...] = jnp.zeros_like(nacc_ref)
        dacc_ref[...] = jnp.zeros_like(dacc_ref)

    x = src_ref[...].astype(jnp.float32)                     # (M, TC)
    t = tgt_ref[...].astype(jnp.float32)
    col = lax.broadcasted_iota(jnp.int32, x.shape, 1) + ct * tc
    valid = (col < hw).astype(jnp.float32)

    prob, loss = _sigmoid_and_focal(x, t, alpha, gamma)
    facc_ref[...] = facc_ref[...] + jnp.sum(loss * valid)

    p = prob * valid
    tv = t * valid
    nacc_ref[...] += jnp.sum(p * tv, axis=1, keepdims=True)
    dacc_ref[...] += jnp.sum(p + tv, axis=1, keepdims=True)

    @pl.when(ct == pl.num_programs(0) - 1)
    def _finalize():
        dice = 1.0 - (2.0 * nacc_ref[...] + 1.0) / (dacc_ref[...] + 1.0)
        dsum = jnp.sum(dice)
        lane = lax.broadcasted_iota(jnp.int32, out_ref.shape, 1)
        out_ref[...] = jnp.where(lane == 0, facc_ref[...],
                                 jnp.where(lane == 1, dsum, 0.0))


def fused_mask_losses(src_flat, tgt_flat, num_boxes, alpha=0.25, gamma=2.0):
    """Returns (loss_mask, loss_dice) matching torch sigmoid_focal_loss + dice_loss."""
    M, HW = src_flat.shape
    # lane-dense column tile, capped so one input tile stays <= ~2 MiB (v7x-safe)
    cap = max(128, (2 * 1024 * 1024 // (max(M, 1) * 4)) // 128 * 128)
    tc = max(128, min(_round_up(HW, 128), cap))
    hw_pad = _round_up(HW, tc)

    src_p, tgt_p = src_flat, tgt_flat
    if hw_pad != HW:
        src_p = jnp.pad(src_flat, ((0, 0), (0, hw_pad - HW)))
        tgt_p = jnp.pad(tgt_flat, ((0, 0), (0, hw_pad - HW)))

    tile_bytes = M * tc * 4
    kern = functools.partial(_mask_losses_kernel, alpha=alpha, gamma=gamma,
                             hw=HW, tc=tc)
    out = pl.pallas_call(
        kern,
        out_shape=jax.ShapeDtypeStruct((1, 128), jnp.float32),
        grid=(hw_pad // tc,),
        in_specs=[pl.BlockSpec((M, tc), lambda c: (0, c)),
                  pl.BlockSpec((M, tc), lambda c: (0, c))],
        out_specs=pl.BlockSpec((1, 128), lambda c: (0, 0)),
        scratch_shapes=[pltpu.VMEM((1, 1), jnp.float32),
                        pltpu.VMEM((M, 1), jnp.float32),
                        pltpu.VMEM((M, 1), jnp.float32)],
        compiler_params=_compiler_params(1, tile_bytes, tile_bytes),
    )(src_p, tgt_p)
    loss_mask = out[0, 0] / HW / num_boxes      # .mean(1).sum() / num_boxes
    loss_dice = out[0, 1] / num_boxes
    return loss_mask, loss_dice


# ----------------------------------------------------------------------------
# Kernel 3: box L1 + GIoU, lane-transposed layout
#   packed [8, M_pad128]: rows 0..3 = src (cx,cy,w,h), rows 4..7 = tgt
#   out    [1, 128] f32 (lane 0 = L1 sum, lane 1 = GIoU-loss sum)
# ----------------------------------------------------------------------------

def _box_losses_kernel(box_ref, out_ref, *, m):
    b = box_ref[...].astype(jnp.float32)                     # (8, M_pad)
    lanes = lax.broadcasted_iota(jnp.int32, (1, b.shape[1]), 1)
    valid = (lanes < m).astype(jnp.float32)                  # (1, M_pad)

    s, t = b[0:4, :], b[4:8, :]
    l1 = jnp.sum(jnp.abs(s - t) * valid)

    def xyxy(v):
        cx, cy, w, h = v[0:1, :], v[1:2, :], v[2:3, :], v[3:4, :]
        return cx - 0.5 * w, cy - 0.5 * h, cx + 0.5 * w, cy + 0.5 * h

    x1, y1, x2, y2 = xyxy(s)
    x1g, y1g, x2g, y2g = xyxy(t)
    xk1 = jnp.maximum(x1, x1g)
    yk1 = jnp.maximum(y1, y1g)
    xk2 = jnp.minimum(x2, x2g)
    yk2 = jnp.minimum(y2, y2g)
    inter = jnp.where((yk2 > yk1) & (xk2 > xk1), (xk2 - xk1) * (yk2 - yk1), 0.0)
    area1 = (x2 - x1) * (y2 - y1)
    area2 = (x2g - x1g) * (y2g - y1g)
    eps = 1e-7
    union = area1 + area2 - inter + eps
    iou = inter / union
    xc1 = jnp.minimum(x1, x1g)
    yc1 = jnp.minimum(y1, y1g)
    xc2 = jnp.maximum(x2, x2g)
    yc2 = jnp.maximum(y2, y2g)
    area_c = (xc2 - xc1) * (yc2 - yc1) + eps
    miou = iou - (area_c - union) / area_c
    giou = jnp.sum((1.0 - miou) * valid)

    lane = lax.broadcasted_iota(jnp.int32, out_ref.shape, 1)
    out_ref[...] = jnp.where(lane == 0, l1, jnp.where(lane == 1, giou, 0.0))


def box_losses(src_boxes, tgt_boxes):
    M = src_boxes.shape[0]
    m_pad = _round_up(max(M, 1), 128)
    packed = jnp.zeros((8, m_pad), jnp.float32)
    packed = packed.at[0:4, :M].set(src_boxes.T.astype(jnp.float32))
    packed = packed.at[4:8, :M].set(tgt_boxes.T.astype(jnp.float32))
    out = pl.pallas_call(
        functools.partial(_box_losses_kernel, m=M),
        out_shape=jax.ShapeDtypeStruct((1, 128), jnp.float32),
        grid=(1,),
        in_specs=[pl.BlockSpec((8, m_pad), lambda i: (0, 0))],
        out_specs=pl.BlockSpec((1, 128), lambda i: (0, 0)),
        compiler_params=_compiler_params(1, 8 * m_pad * 4),
    )(packed)
    return out[0, 0], out[0, 1]


# ----------------------------------------------------------------------------
# SetCriterion (forward-pass semantics of the torch module)
# ----------------------------------------------------------------------------

class SetCriterion:
    def __init__(self, num_classes, matcher, weight_dict, losses,
                 focal_alpha=0.25, mask_out_stride=4, num_frames=1):
        self.num_classes = num_classes
        self.matcher = matcher            # matching is an external input (indices_list)
        self.weight_dict = weight_dict
        self.losses = losses
        self.focal_alpha = focal_alpha
        self.mask_out_stride = mask_out_stride
        self.num_frames = num_frames

    # ---- helpers -------------------------------------------------------------
    def _build_target_classes(self, indices, targets, B, Q):
        target_classes = jnp.full((B, Q), self.num_classes, dtype=jnp.int32)
        n_matched = 0
        for b in range(B):
            valid_query, gt_multi_idx = indices[b]
            if len(gt_multi_idx) == 0:
                continue
            tgt_cls_o = targets[b]['labels'][jnp.asarray(gt_multi_idx)]
            target_classes = target_classes.at[b, jnp.asarray(valid_query)].set(tgt_cls_o)
            n_matched += int(len(gt_multi_idx))
        return target_classes, n_matched

    # ---- classification focal loss (single level, kept for get_loss parity) --
    def loss_labels(self, outputs, targets, ref_target, indices, num_boxes, log=True):
        src_logits = outputs['pred_logits']
        B, Q, C = src_logits.shape
        target_classes, n_matched = self._build_target_classes(indices, targets, B, Q)
        sums = batched_focal_ce_sums(src_logits.reshape(1, B * Q, C),
                                     target_classes.reshape(1, B * Q),
                                     alpha=self.focal_alpha, gamma=2.0)
        return {'loss_ce': sums[0] / max(n_matched, 1)}

    # ---- classification focal loss batched across ALL decoder levels ----------
    def _loss_labels_all_levels(self, outputs, aux_outputs_list, targets, indices_list):
        levels = [(aux, indices_list[i], f'_{i}') for i, aux in enumerate(aux_outputs_list)]
        levels.append((outputs, indices_list[-1], ''))
        B, Q, C = outputs['pred_logits'].shape
        logits_stack, cls_stack, n_matched_list = [], [], []
        for lvl_out, indices, _ in levels:
            target_classes, n_matched = self._build_target_classes(indices, targets, B, Q)
            logits_stack.append(lvl_out['pred_logits'].reshape(B * Q, C))
            cls_stack.append(target_classes.reshape(B * Q))
            n_matched_list.append(max(n_matched, 1))
        sums = batched_focal_ce_sums(jnp.stack(logits_stack, axis=0),
                                     jnp.stack(cls_stack, axis=0),
                                     alpha=self.focal_alpha, gamma=2.0)
        return {'loss_ce' + suffix: sums[l] / n_matched_list[l]
                for l, (_, _, suffix) in enumerate(levels)}

    # ---- cardinality (logging-only metric; plain JAX, no grad in reference) --
    def loss_cardinality(self, outputs, targets, ref_target, indices, num_boxes):
        pred_logits = outputs['pred_logits']
        tgt_lengths = jnp.asarray([len(t['labels']) for t in targets], dtype=jnp.float32)
        card_pred = jnp.sum(
            jnp.argmax(pred_logits, axis=-1) != (pred_logits.shape[-1] - 1), axis=1)
        card_err = jnp.mean(jnp.abs(card_pred.astype(jnp.float32) - tgt_lengths))
        return {'cardinality_error': card_err}

    # ---- box L1 + GIoU -------------------------------------------------------
    def loss_boxes(self, outputs, targets, ref_target, indices, num_boxes):
        src_boxes = outputs['pred_boxes']                # [B, Q, 4]
        pred_box_list, tgt_box_list = [], []
        for b in range(len(targets)):
            valid_query, gt_multi_idx = indices[b]
            if len(gt_multi_idx) == 0:
                continue
            pred_box_list.append(src_boxes[b][jnp.asarray(valid_query)])
            tgt_box_list.append(targets[b]['boxes'][jnp.asarray(gt_multi_idx)])
        if len(pred_box_list) != 0:
            src_m = jnp.concatenate(pred_box_list, axis=0)
            tgt_m = jnp.concatenate(tgt_box_list, axis=0)
            n = src_m.shape[0]
            l1_sum, giou_sum = box_losses(src_m, tgt_m)
            return {'loss_bbox': l1_sum / n, 'loss_giou': giou_sum / n}
        zero = jnp.sum(outputs['pred_boxes']) * 0.0
        return {'loss_bbox': zero, 'loss_giou': zero}

    # ---- mask focal + dice (fused kernel) -------------------------------------
    def loss_masks(self, outputs, targets, ref_target, indices, num_boxes):
        src_masks = outputs['pred_masks']                # [M, 1, h, w]
        if isinstance(src_masks, (list, tuple)):
            src_masks = jnp.concatenate(src_masks, axis=1)[0]
        start = int(self.mask_out_stride // 2)
        tgt_mask_list = []
        for b in range(len(targets)):
            _, gt_multi_idx = indices[b]
            if len(gt_multi_idx) == 0:
                continue
            # nested-tensor padding is a no-op here (equal-sized synthetic masks)
            m = targets[b]['masks'][:, start::self.mask_out_stride, start::self.mask_out_stride]
            tgt_mask_list.append(m[jnp.asarray(gt_multi_idx)][:, None])
        if len(tgt_mask_list) != 0:
            target_masks = jnp.concatenate(tgt_mask_list, axis=0).astype(src_masks.dtype)
            num_boxes = src_masks.shape[0]
            # TODO(synk): F.interpolate resize omitted; synthetic targets already match src spatial size.
            assert src_masks.shape == target_masks.shape
            src_flat = src_masks.reshape(src_masks.shape[0], -1)
            tgt_flat = target_masks.reshape(target_masks.shape[0], -1)
            loss_mask, loss_dice = fused_mask_losses(src_flat, tgt_flat, num_boxes,
                                                     alpha=0.25, gamma=2.0)
            return {'loss_mask': loss_mask, 'loss_dice': loss_dice}
        zero = jnp.sum(src_masks * 0)
        return {'loss_mask': zero, 'loss_dice': zero}

    # ---- dispatch / forward --------------------------------------------------
    def get_loss(self, loss, outputs, targets, ref_target, indices, num_boxes, **kwargs):
        # TODO(synk): 'reid' loss not translated (ragged per-item contrastive python lists).
        loss_map = {'labels': self.loss_labels,
                    'cardinality': self.loss_cardinality,
                    'boxes': self.loss_boxes,
                    'masks': self.loss_masks}
        assert loss in loss_map, f'do you really want to compute {loss} loss?'
        return loss_map[loss](outputs, targets, ref_target, indices, num_boxes, **kwargs)

    def forward(self, outputs, targets, ref_target, indices_list):
        # TODO(synk): distributed all_reduce of num_boxes omitted (single host).
        num_boxes = max(float(sum(len(t['labels']) for t in targets)), 1.0)
        aux_outputs_list = outputs.get('aux_outputs', [])
        losses = {}

        # Classification focal loss for main + all aux levels in ONE Pallas launch.
        if 'labels' in self.losses:
            losses.update(self._loss_labels_all_levels(
                outputs, aux_outputs_list, targets, indices_list))

        # Remaining losses, final decoder level.
        for loss in self.losses:
            if loss == 'labels':
                continue
            losses.update(self.get_loss(loss, outputs, targets, ref_target,
                                        indices_list[-1], num_boxes))

        # Remaining losses, aux levels.
        # TODO(synk): boxes/masks aux levels still launch per level (ragged matched
        # counts per level prevent a trivial stacked launch).
        for i, aux_outputs in enumerate(aux_outputs_list):
            indices = indices_list[i]
            for loss in self.losses:
                if loss in ('labels', 'reid'):
                    continue
                l_dict = self.get_loss(loss, aux_outputs, targets, ref_target,
                                       indices, num_boxes)
                losses.update({k + f'_{i}': v for k, v in l_dict.items()})
        return losses


# ----------------------------------------------------------------------------
# Demo
# ----------------------------------------------------------------------------

if __name__ == "__main__":
    key = jax.random.PRNGKey(0)
    B, Q, C = 2, 16, 5            # batch, queries, num_classes
    Himg, Wimg = 32, 32
    stride = 4
    hs, ws = Himg // stride, Wimg // stride   # 8 x 8 mask resolution

    keys = jax.random.split(key, 10)
    pred_logits = jax.random.normal(keys[0], (B, Q, C), dtype=jnp.float32)
    pred_boxes = jax.random.uniform(keys[1], (B, Q, 4), minval=0.2, maxval=0.6,
                                    dtype=jnp.float32)

    # Hungarian matching results (normally produced by the matcher), per level.
    indices_main = [
        (jnp.array([1, 3], dtype=jnp.int32), jnp.array([0, 1], dtype=jnp.int32)),
        (jnp.array([0, 5, 7], dtype=jnp.int32), jnp.array([2, 0, 1], dtype=jnp.int32)),
    ]
    indices_aux0 = [
        (jnp.array([2, 4], dtype=jnp.int32), jnp.array([1, 0], dtype=jnp.int32)),
        (jnp.array([1, 6, 9], dtype=jnp.int32), jnp.array([0, 2, 1], dtype=jnp.int32)),
    ]
    M = 5  # total matched instances
    pred_masks = jax.random.normal(keys[2], (M, 1, hs, ws), dtype=jnp.float32)

    targets = [
        {'labels': jnp.array([1, 3], dtype=jnp.int32),
         'boxes': jax.random.uniform(keys[3], (2, 4), minval=0.2, maxval=0.6, dtype=jnp.float32),
         'masks': (jax.random.uniform(keys[4], (2, Himg, Wimg)) > 0.5).astype(jnp.float32)},
        {'labels': jnp.array([0, 2, 4], dtype=jnp.int32),
         'boxes': jax.random.uniform(keys[5], (3, 4), minval=0.2, maxval=0.6, dtype=jnp.float32),
         'masks': (jax.random.uniform(jax.random.PRNGKey(7), (3, Himg, Wimg)) > 0.5).astype(jnp.float32)},
    ]
    ref_target = [{'masks': t['masks']} for t in targets]

    aux_outputs = [{
        'pred_logits': jax.random.normal(keys[6], (B, Q, C), dtype=jnp.float32),
        'pred_boxes': jax.random.uniform(keys[7], (B, Q, 4), minval=0.2, maxval=0.6,
                                         dtype=jnp.float32),
        'pred_masks': jax.random.normal(keys[8], (M, 1, hs, ws), dtype=jnp.float32),
    }]

    outputs = {'pred_logits': pred_logits,
               'pred_boxes': pred_boxes,
               'pred_masks': pred_masks,
               'aux_outputs': aux_outputs}

    criterion = SetCriterion(
        num_classes=C, matcher=None,
        weight_dict={'loss_ce': 2.0, 'loss_bbox': 5.0, 'loss_giou': 2.0,
                     'loss_mask': 5.0, 'loss_dice': 5.0},
        losses=['labels', 'cardinality', 'boxes', 'masks'],
        focal_alpha=0.25, mask_out_stride=stride, num_frames=1)

    losses = criterion.forward(outputs, targets, ref_target,
                               indices_list=[indices_aux0, indices_main])
    for v in losses.values():
        jax.block_until_ready(v)
    print("KERNEL_OK")
</pallas_src>

<mosaic_0001>
module attributes {stable_mosaic.version = 11 : i64} {
  func.func @_focal_ce_kernel(%arg0: i32, %arg1: i32, %arg2: memref<1x32x128xf32, #tpu.memory_space<vmem>>, %arg3: memref<1x32x1xi32, #tpu.memory_space<vmem>>, %arg4: memref<1x128xf32, #tpu.memory_space<vmem>>, %arg5: memref<1x1xf32, #tpu.memory_space<vmem>>) attributes {dimension_semantics = [#tpu.dimension_semantics<arbitrary>, #tpu.dimension_semantics<arbitrary>], iteration_bounds = array<i64: 2, 1>, scalar_prefetch = 0 : i64, scratch_operands = 1 : i64, tpu.core_type = #tpu.core_type<tc>, window_params = [{transform_indices = @transform_0, window_bounds = array<i64: 1, 32, 128>}, {transform_indices = @transform_1, window_bounds = array<i64: 1, 32, 1>}, {pipeline_mode = #tpu.pipeline_mode<synchronous>, transform_indices = @transform_2, window_bounds = array<i64: 1, 128>}]} {
    %c0_i32 = arith.constant 0 : i32
    %0 = arith.cmpi eq, %arg0, %c0_i32 : i32
    %c0_i32_0 = arith.constant 0 : i32
    %1 = arith.cmpi eq, %arg1, %c0_i32_0 : i32
    %2 = arith.andi %0, %1 : i1
    %3 = arith.extui %2 : i1 to i32
    %c0_i32_1 = arith.constant 0 : i32
    %4 = arith.cmpi ne, %3, %c0_i32_1 : i32
    scf.if %4 {
      %cst_30 = arith.constant 0.000000e+00 : f32
      %79 = vector.broadcast %cst_30 : f32 to vector<1x128xf32>
      %c0_31 = arith.constant 0 : index
      %c0_32 = arith.constant 0 : index
      %80 = vector.load %arg4[%c0_31, %c0_32] : memref<1x128xf32, #tpu.memory_space<vmem>>, vector<1x128xf32>
      tpu.vector_store %arg4[%c0_31, %c0_32], %79 {strides = array<i32>} : memref<1x128xf32, #tpu.memory_space<vmem>>, vector<1x128xf32>,
    } else {
    }
    %c0_i32_2 = arith.constant 0 : i32
    %5 = arith.cmpi eq, %arg1, %c0_i32_2 : i32
    %6 = arith.extui %5 : i1 to i32
    %c0_i32_3 = arith.constant 0 : i32
    %7 = arith.cmpi ne, %6, %c0_i32_3 : i32
    scf.if %7 {
      %cst_30 = arith.constant 0.000000e+00 : f32
      %79 = vector.broadcast %cst_30 : f32 to vector<1x1xf32>
      %c0_31 = arith.constant 0 : index
      %c0_32 = arith.constant 0 : index
      %80 = vector.load %arg5[%c0_31, %c0_32] : memref<1x1xf32, #tpu.memory_space<vmem>>, vector<1x1xf32>
      tpu.vector_store %arg5[%c0_31, %c0_32], %79 {strides = array<i32>} : memref<1x1xf32, #tpu.memory_space<vmem>>, vector<1x1xf32>,
    } else {
    }
    %c0 = arith.constant 0 : index
    %c0_4 = arith.constant 0 : index
    %c0_5 = arith.constant 0 : index
    %8 = vector.load %arg2[%c0, %c0_4, %c0_5] : memref<1x32x128xf32, #tpu.memory_space<vmem>>, vector<1x32x128xf32>
    %9 = vector.shape_cast %8 : vector<1x32x128xf32> to vector<32x128xf32>
    %c0_6 = arith.constant 0 : index
    %c0_7 = arith.constant 0 : index
    %c0_8 = arith.constant 0 : index
    %10 = vector.load %arg3[%c0_6, %c0_7, %c0_8] : memref<1x32x1xi32, #tpu.memory_space<vmem>>, vector<1x32x1xi32>
    %11 = vector.shape_cast %10 : vector<1x32x1xi32> to vector<32x1xi32>
    %12 = tpu.iota {dimensions = array<i32: 1>} : vector<32x128xi32>
    %13 = tpu.iota {dimensions = array<i32: 0>} : vector<32x128xi32>
    %c32_i32 = arith.constant 32 : i32
    %14 = arith.muli %arg1, %c32_i32 : i32
    %15 = vector.broadcast %14 : i32 to vector<32x128xi32>
    %16 = arith.addi %13, %15 : vector<32x128xi32>
    %17 = vector.broadcast %11 : vector<32x1xi32> to vector<32x128xi32>
    %18 = arith.cmpi eq, %12, %17 : vector<32x128xi32>
    %c5_i32 = arith.constant 5 : i32
    %19 = vector.broadcast %c5_i32 : i32 to vector<32x128xi32>
    %20 = arith.cmpi slt, %12, %19 : vector<32x128xi32>
    %21 = arith.andi %18, %20 : vector<32x128xi1>
    %cst = arith.constant 1.000000e+00 : f32
    %cst_9 = arith.constant 0.000000e+00 : f32
    %22 = vector.broadcast %cst : f32 to vector<32x128xf32>
    %23 = vector.broadcast %cst_9 : f32 to vector<32x128xf32>
    %24 = arith.select %21, %22, %23 : vector<32x128xi1>, vector<32x128xf32>
    %c32_i32_10 = arith.constant 32 : i32
    %25 = vector.broadcast %c32_i32_10 : i32 to vector<32x128xi32>
    %26 = arith.cmpi slt, %16, %25 : vector<32x128xi32>
    %c5_i32_11 = arith.constant 5 : i32
    %27 = vector.broadcast %c5_i32_11 : i32 to vector<32x128xi32>
    %28 = arith.cmpi slt, %12, %27 : vector<32x128xi32>
    %29 = arith.andi %26, %28 : vector<32x128xi1>
    %30 = math.absf %9 : vector<32x128xf32>
    %cst_12 = arith.constant 0.000000e+00 : f32
    %31 = vector.broadcast %cst_12 : f32 to vector<32x128xf32>
    %32 = arith.subf %31, %30 : vector<32x128xf32>
    %33 = math.exp %32 : vector<32x128xf32>
    %cst_13 = arith.constant 1.000000e+00 : f32
    %34 = vector.broadcast %cst_13 : f32 to vector<32x128xf32>
    %35 = arith.addf %34, %33 : vector<32x128xf32>
    %36 = tpu.reciprocal %35 {approx = true} : vector<32x128xf32> -> vector<32x128xf32>
    %cst_14 = arith.constant 0.000000e+00 : f32
    %37 = vector.broadcast %cst_14 : f32 to vector<32x128xf32>
    %38 = arith.cmpf oge, %9, %37 : vector<32x128xf32>
    %39 = arith.mulf %33, %36 : vector<32x128xf32>
    %40 = arith.select %38, %36, %39 : vector<32x128xi1>, vector<32x128xf32>
    %cst_15 = arith.constant 0.000000e+00 : f32
    %41 = vector.broadcast %cst_15 : f32 to vector<32x128xf32>
    %42 = arith.maximumf %9, %41 : vector<32x128xf32>
    %43 = arith.mulf %9, %24 : vector<32x128xf32>
    %44 = arith.subf %42, %43 : vector<32x128xf32>
    %45 = math.log1p %33 : vector<32x128xf32>
    %46 = arith.addf %44, %45 : vector<32x128xf32>
    %47 = arith.mulf %40, %24 : vector<32x128xf32>
    %cst_16 = arith.constant 1.000000e+00 : f32
    %48 = vector.broadcast %cst_16 : f32 to vector<32x128xf32>
    %49 = arith.subf %48, %40 : vector<32x128xf32>
    %cst_17 = arith.constant 1.000000e+00 : f32
    %50 = vector.broadcast %cst_17 : f32 to vector<32x128xf32>
    %51 = arith.subf %50, %24 : vector<32x128xf32>
    %52 = arith.mulf %49, %51 : vector<32x128xf32>
    %53 = arith.addf %47, %52 : vector<32x128xf32>
    %cst_18 = arith.constant 1.000000e+00 : f32
    %54 = vector.broadcast %cst_18 : f32 to vector<32x128xf32>
    %55 = arith.subf %54, %53 : vector<32x128xf32>
    %56 = arith.mulf %55, %55 : vector<32x128xf32>
    %57 = arith.mulf %46, %56 : vector<32x128xf32>
    %cst_19 = arith.constant 2.500000e-01 : f32
    %58 = vector.broadcast %cst_19 : f32 to vector<32x128xf32>
    %59 = arith.mulf %58, %24 : vector<32x128xf32>
    %cst_20 = arith.constant 1.000000e+00 : f32
    %60 = vector.broadcast %cst_20 : f32 to vector<32x128xf32>
    %61 = arith.subf %60, %24 : vector<32x128xf32>
    %cst_21 = arith.constant 7.500000e-01 : f32
    %62 = vector.broadcast %cst_21 : f32 to vector<32x128xf32>
    %63 = arith.mulf %62, %61 : vector<32x128xf32>
    %64 = arith.addf %59, %63 : vector<32x128xf32>
    %65 = arith.mulf %64, %57 : vector<32x128xf32>
    %c0_22 = arith.constant 0 : index
    %c0_23 = arith.constant 0 : index
    %66 = vector.load %arg5[%c0_22, %c0_23] : memref<1x1xf32, #tpu.memory_space<vmem>>, vector<1x1xf32>
    %cst_24 = arith.constant 0.000000e+00 : f32
    %67 = vector.broadcast %cst_24 : f32 to vector<32x128xf32>
    %68 = arith.select %29, %65, %67 : vector<32x128xi1>, vector<32x128xf32>
    %69 = vector.shape_cast %68 : vector<32x128xf32> to vector<1x32x128xf32>
    %cst_25 = arith.constant dense<0.000000e+00> : vector<1xf32>
    %70 = vector.multi_reduction <add>, %69, %cst_25 [1, 2] : vector<1x32x128xf32> to vector<1xf32>
    %71 = vector.shape_cast %70 : vector<1xf32> to vector<1x1x1xf32>
    %72 = vector.extract %71[0, 0, 0] : f32 from vector<1x1x1xf32>
    %73 = vector.broadcast %72 : f32 to vector<1x1xf32>
    %74 = arith.addf %66, %73 : vector<1x1xf32>
    %c0_26 = arith.constant 0 : index
    %c0_27 = arith.constant 0 : index
    %75 = vector.load %arg5[%c0_26, %c0_27] : memref<1x1xf32, #tpu.memory_space<vmem>>, vector<1x1xf32>
    tpu.vector_store %arg5[%c0_26, %c0_27], %74 {strides = array<i32>} : memref<1x1xf32, #tpu.memory_space<vmem>>, vector<1x1xf32>,
    %c0_i32_28 = arith.constant 0 : i32
    %76 = arith.cmpi eq, %arg1, %c0_i32_28 : i32
    %77 = arith.extui %76 : i1 to i32
    %c0_i32_29 = arith.constant 0 : i32
    %78 = arith.cmpi ne, %77, %c0_i32_29 : i32
    scf.if %78 {
      %79 = tpu.iota {dimensions = array<i32: 1>} : vector<1x128xi32>
      %80 = vector.broadcast %arg0 : i32 to vector<1x128xi32>
      %81 = arith.cmpi eq, %79, %80 : vector<1x128xi32>
      %c0_30 = arith.constant 0 : index
      %c0_31 = arith.constant 0 : index
      %82 = vector.load %arg5[%c0_30, %c0_31] : memref<1x1xf32, #tpu.memory_space<vmem>>, vector<1x1xf32>
      %c0_32 = arith.constant 0 : index
      %c0_33 = arith.constant 0 : index
      %83 = vector.load %arg4[%c0_32, %c0_33] : memref<1x128xf32, #tpu.memory_space<vmem>>, vector<1x128xf32>
      %84 = vector.shape_cast %82 : vector<1x1xf32> to vector<1x1xf32>
      %85 = vector.broadcast %84 : vector<1x1xf32> to vector<1x128xf32>
      %86 = arith.select %81, %85, %83 : vector<1x128xi1>, vector<1x128xf32>
      %c0_34 = arith.constant 0 : index
      %c0_35 = arith.constant 0 : index
      %87 = vector.load %arg4[%c0_34, %c0_35] : memref<1x128xf32, #tpu.memory_space<vmem>>, vector<1x128xf32>
      tpu.vector_store %arg4[%c0_34, %c0_35], %86 {strides = array<i32>} : memref<1x128xf32, #tpu.memory_space<vmem>>, vector<1x128xf32>,
    } else {
    }
    return
  }
  func.func @transform_0(%arg0: i32, %arg1: i32) -> (i32, i32, i32) {
    %c0_i32 = arith.constant 0 : i32
    %c0_i32_0 = arith.constant 0 : i32
    return %arg0, %arg1, %c0_i32 : i32, i32, i32
  }
  func.func @transform_1(%arg0: i32, %arg1: i32) -> (i32, i32, i32) {
    %c0_i32 = arith.constant 0 : i32
    %c0_i32_0 = arith.constant 0 : i32
    return %arg0, %arg1, %c0_i32 : i32, i32, i32
  }
  func.func @transform_2(%arg0: i32, %arg1: i32) -> (i32, i32) {
    %c0_i32 = arith.constant 0 : i32
    %c0_i32_0 = arith.constant 0 : i32
    %c0_i32_1 = arith.constant 0 : i32
    return %c0_i32, %c0_i32_0 : i32, i32
  }
}

</mosaic_0001>

<bundles_post_ra>
// kernel: tpu_custom_call.1
= control target key start
LH: loop header
LB: loop body
LE: loop exit
PB: predicated region body
PF: predicated region fallthrough
CT: control target
= control target key end

     0   :  { %7 = vsyncpa [#allocation4], 0  ;;  %s665_s9 = smov 0   ;;  %s667_s10 = smov 0   ;;  %s855_s0 = inlined_call_operand.vmem [shape: f32[2,32,128], index: 0, kind: input, shape index: {}]   ;;  %s856_s1 = inlined_call_operand.vmem [shape: s32[2,32,1], index: 1, kind: input, shape index: {}]   ;;  %s857_s2 = inlined_call_operand.hbm [shape: f32[1,128], index: 2, kind: output, shape index: {}]  }
   0x1   :  { %s669_s11 = smov 0  }
   0x2 LB: > { %s514_s12 = sadd.s32 4294967295, %s644_s11   ;;  %s25_s13 = sadd.s32 1, %s640_s10  ;;  %s644_s11 = sphi %s669_s11, %s13_s11   ;;  %s640_s10 = sphi %s667_s10, %s868_s10   ;;  %s636_s9 = sphi %s665_s9, %s867_s9  }
   0x3   : > { %p27_p0 = scmp.ge.s32.totalorder %s25_s13, 2  ;;  %p517_p1 = scmp.ge.s32.totalorder %s644_s11, 1 }
   0x4   : > { %p144_p2 = scmp.lt.s32.totalorder %s644_s11, 3 }
   0x5   : > { %s870_s13 = smov (%p27_p0, %s25_s13), 0 }
   0x6   : > { %p145_p3 = pnand %p517_p1, %p144_p2 }
   0x7   : > { %p175_p4 = scmp.lt.s32.totalorder (!%p145_p3), %s636_s9, 1  ;;  %p194_p5 = scmp.eq.s32.totalorder (!%p145_p3), %s636_s9, 0 }
   0x8   : > { %148 = sbr.rel (%p145_p3) target bundleno = 543 (0x21f), region = 28 }
   0xf   : > { %s176_s14 = scalar_select %p175_p4, %s636_s9, 1 }
  0x10   : > { %199 = sbr.rel (!%p194_p5) target bundleno = 23 (0x17), region = 32  ;;  %v646_v0 = vmov (%p194_p5), 0.0  }
  0x11   : > { %s527_s15 = sshll.u32 %s176_s14, 5  ;;  %200 = vst [vmem:[#allocation3] sm:$0x1] (%p194_p5), %v646_v0 }
  0x12   : > { %s182_s18 = scalar_lea.vmem %s855_s0, %s527_s15  ;;  %s192_s21 = scalar_lea.vmem %s856_s1, %s527_s15 }
  0x17 PF: > { %v212_v1 = vld [vmem:[%s192_s21 + $0x10] sm:$0xff]  ;;  %v210_v2 = vld [vmem:[%s192_s21] sm:$0xff]  ;;  %v647_v3 = vmov 0   ;;  %v213_v4 = vld [vmem:[%s192_s21 + $0x18] sm:$0xff]  ;;  %v214_v30 = vlaneseq  ;;  %v648_v63 = vmov 0.0   ;;  %s649_s23 = smov [#allocation3]  }
  0x18   : > { %567 = vset.pattern.permute.xlu1 %v647_v3  ;;  %566 = vset.pattern.permute.xlu0 %v647_v3  ;;  %v211_v5 = vld [vmem:[%s192_s21 + $0x8] sm:$0xff]  ;;  %v695_v6 = vld [vmem:[%s182_s18 + $0x10] sm:$0xff]  ;;  %v698_v8 = vld [vmem:[%s182_s18] sm:$0xff]  ;;  %s442_s24 = sshll.u32 %s649_s23, 4  ;;  %p820_p6 = scmp.eq.s32.totalorder %s514_s12, 1  ;;  %s443_s24 = int_to_ptr.vmem [resolvable:$true] %s442_s24 }
  0x19   : > { %234 = vperm.xlu1 %567, %v212_v1   ;;  %228 = vperm.xlu0 %566, %v210_v2   ;;  %v262_v7 = vand.u32 2147483647, %v695_v6  ;;  %v700_v9 = vld [vmem:[%s182_s18 + $0x18] sm:$0xff]  ;;  %v260_v10 = vand.u32 2147483647, %v698_v8  ;;  %v704_v13 = vld [vmem:[%s182_s18 + $0x8] sm:$0xff]  ;;  %p599_p10 = scmp.lt.s32.totalorder %s443_s24, %s443_s24 }
  0x1a   : > { %v263_v12 = vand.u32 2147483647, %v700_v9  ;;  %v261_v16 = vand.u32 2147483647, %v704_v13  ;;  %v714_v31 = vand.u32 127, %v214_v30  ;;  %vm286_vm1 = vcmp.ge.f32.partialorder %v695_v6, 0.0 }
  0x1b   : > { %v266_v11 = vsub.f32 0.0, %v262_v7  ;;  %v264_v14 = vsub.f32 0.0, %v260_v10  ;;  %v298_v37 = vmax.f32 %v695_v6, 0.0  ;;  %vm284_vm2 = vcmp.ge.f32.partialorder %v698_v8, 0.0  ;;  %s592_s26 = scalar_lea.vmem %s443_s24, 16  ;;  %s598_s27 = scalar_lea.vmem %s443_s24, 32 }
  0x1c   : > { %v267_v17 = vsub.f32 0.0, %v263_v12  ;;  %v265_v19 = vsub.f32 0.0, %v261_v16  ;;  %vm243_vm0 = vcmp.lt.s32.totalorder %v714_v31, 5  ;;  %v296_v40 = vmax.f32 %v698_v8, 0.0  ;;  %p593_p7 = scmp.ne.s32.totalorder %s443_s24, %s592_s26  ;;  %p600_p11 = scmp.lt.s32.totalorder %s598_s27, %s592_s26 }
  0x1d   : > { %237 = vperm.xlu1 %567, %v213_v4   ;;  %231 = vperm.xlu0 %566, %v211_v5   ;;  %v272_v15 = vmul.f32 1.442695, %v266_v11  ;;  %v268_v18 = vmul.f32 1.442695, %v264_v14  ;;  %vm287_vm3 = vcmp.ge.f32.partialorder %v700_v9, 0.0  ;;  %vm285_vm4 = vcmp.ge.f32.partialorder %v704_v13, 0.0 }
  0x1e   : > { %v274_v20 = vmul.f32 1.442695, %v267_v17  ;;  %v270_v21 = vmul.f32 1.442695, %v265_v19  ;;  %v299_v47 = vmax.f32 %v700_v9, 0.0  ;;  %v297_v54 = vmax.f32 %v704_v13, 0.0  ;;  %p594_p8 = pnand %p593_p7, %p820_p6  ;;  %p601_p12 = por %p600_p11, %p599_p10 }
  0x1f   : > { %568 = vpow2.f32 %v272_v15 }
  0x20   : > { %570 = vpow2.f32 %v268_v18  ;;  %p595_p9 = pneg %p594_p8 }
  0x21   : > { %572 = vpow2.f32 %v274_v20 }
  0x22   : > { %574 = vpow2.f32 %v270_v21  ;;  %p602_p13 = pnand %p601_p12, %p595_p9 }
  0x29   : > { %v569_v22 = vpop.eup %568 }
  0x2a   : > { %v571_v23 = vpop.eup %570  ;;  %v278_v24 = vadd.f32 1.0, %v569_v22  ;;  %v329_v33 = vmul.f32 -0.5, %v569_v22  ;;  %v332_v44 = vand.u32 2147483647, %v569_v22 }
  0x2b   : > { %v707_v25 = vpop.eup %572  ;;  %v276_v26 = vadd.f32 1.0, %v571_v23  ;;  %v311_v36 = vmul.f32 -0.5, %v571_v23  ;;  %v314_v38 = vand.u32 2147483647, %v571_v23 }
  0x2c   : > { %576 = vrcp.f32 %v278_v24  ;;  %v709_v27 = vpop.eup %574  ;;  %v279_v28 = vadd.f32 1.0, %v707_v25  ;;  %v330_v41 = vadd.f32 1.0, %v329_v33  ;;  %v338_v48 = vmul.f32 -0.5, %v707_v25 }
  0x2d   : > { %578 = vrcp.f32 %v276_v26  ;;  %v277_v29 = vadd.f32 1.0, %v709_v27  ;;  %v320_v43 = vmul.f32 -0.5, %v709_v27  ;;  %v312_v46 = vadd.f32 1.0, %v311_v36 }
  0x2e   : > { %580 = vrcp.f32 %v279_v28  ;;  %vm728_vm5 = vcmp.lt.f32.partialorder %v314_v38, 0.0004427343  ;;  %v323_v56 = vand.u32 2147483647, %v709_v27  ;;  %v737_v57 = vmul.f32 %v569_v22, %v330_v41 }
  0x2f   : > { %582 = vrcp.f32 %v277_v29  ;;  %v321_v60 = vadd.f32 1.0, %v320_v43  ;;  %vm743_vm9 = vcmp.lt.f32.partialorder %v332_v44, 0.0004427343  ;;  %v341_v62 = vand.u32 2147483647, %v707_v25 }
  0x30   : > { %584 = vlog2.f32 %v276_v26  ;;  %v313_v1 = vmul.f32 %v571_v23, %v312_v46  ;;  %v339_v3 = vadd.f32 1.0, %v338_v48  ;;  %vm767_vm14 = vcmp.lt.f32.partialorder %v323_v56, 0.0004427343 }
  0x31   : > { %586 = vlog2.f32 %v278_v24  ;;  %v322_v19 = vmul.f32 %v709_v27, %v321_v60  ;;  %vm771_vm15 = vcmp.lt.f32.partialorder %v341_v62, 0.0004427343 }
  0x32   : > { %588 = vlog2.f32 %v279_v28  ;;  %v340_v33 = vmul.f32 %v707_v25, %v339_v3 }
  0x33   : > { %590 = vlog2.f32 %v277_v29 }
  0x36   : > { %v577_v32 = vpop.eup %576 }
  0x37   : > { %v579_v34 = vpop.eup %578  ;;  %v290_v35 = vmul.f32 %v577_v32, %v569_v22 }
  0x38   : > { %v581_v39 = vpop.eup %580  ;;  %v288_v42 = vmul.f32 %v579_v34, %v571_v23 }
  0x39   : > { %v294_v45 = vsel %vm286_vm1, %v577_v32, %v290_v35  ;;  %v583_v49 = vpop.eup %582  ;;  %v291_v53 = vmul.f32 %v581_v39, %v707_v25 }
  0x3a   : > { %v585_v55 = vpop.eup %584  ;;  %v354_v58 = vsub.f32 1.0, %v294_v45  ;;  %v292_v59 = vsel %vm284_vm2, %v579_v34, %v288_v42  ;;  %v289_v2 = vmul.f32 %v583_v49, %v709_v27  ;;  %vm204_vm2 = vcmask 0  }
  0x3b   : > { %v310_v7 = vmul.f32 0.6931472, %v585_v55  ;;  %v295_v11 = vsel %vm287_vm3, %v581_v39, %v291_v53  ;;  %v352_v15 = vsub.f32 1.0, %v292_v59  ;;  %v587_v16 = vpop.eup %586  ;;  %205 = vst.msk [vmem:[#allocation2] sm:$0x1] %vm204_vm2, %v648_v63 }
  0x3c   : > { %v589_v22 = vpop.eup %588  ;;  %v355_v26 = vsub.f32 1.0, %v295_v11  ;;  %v293_v28 = vsel %vm285_vm4, %v583_v49, %v289_v2  ;;  %v328_v38 = vmul.f32 0.6931472, %v587_v16 }
  0x3d   : > { %v316_v32 = vsel %vm728_vm5, %v313_v1, %v310_v7  ;;  %v591_v39 = vpop.eup %590  ;;  %v353_v43 = vsub.f32 1.0, %v293_v28  ;;  %v337_v44 = vmul.f32 0.6931472, %v589_v22 }
  0x3f   : > { %v343_v60 = vsel %vm771_vm15, %v340_v33, %v337_v44 }
  0x98   : > { %v235_v50 = vpop.permute.xlu1 %234  ;;  %v229_v51 = vpop.permute.xlu0 %228 }
  0x99   : > { %vm241_vm6 = vcmp.eq.s32.totalorder %v714_v31, %v235_v50  ;;  %vm239_vm7 = vcmp.eq.s32.totalorder %v714_v31, %v229_v51 }
  0x9a   : > { %vm246_vm8 = vmand %vm241_vm6, %vm243_vm0 }
  0x9b   : > { %v749_v0 = vsel %vm246_vm8, 1.0, %v648_v63  ;;  %vm244_vm10 = vmand %vm239_vm7, %vm243_vm0 }
  0x9c   : > { %v350_v4 = vmul.f32 %v294_v45, %v749_v0  ;;  %v358_v5 = vsub.f32 1.0, %v749_v0  ;;  %v238_v10 = vpop.permute.xlu1 %237  ;;  %v232_v12 = vpop.permute.xlu0 %231  ;;  %v248_v14 = vsel %vm244_vm10, 1.0, %v648_v63  ;;  %v302_v27 = vmul.f32 %v749_v0, %v695_v6 }
  0x9d   : > { %vm242_vm11 = vcmp.eq.s32.totalorder %v714_v31, %v238_v10  ;;  %vm240_vm12 = vcmp.eq.s32.totalorder %v714_v31, %v232_v12  ;;  %v300_v18 = vmul.f32 %v248_v14, %v698_v8  ;;  %v356_v23 = vsub.f32 1.0, %v248_v14 }
  0x9e   : > { %v362_v17 = vmul.f32 %v358_v5, %v354_v58  ;;  %vm247_vm13 = vmand %vm242_vm11, %vm243_vm0  ;;  %v348_v34 = vmul.f32 %v292_v59, %v248_v14  ;;  %v306_v25 = vsub.f32 %v298_v37, %v302_v27  ;;  %v319_v8 = vmul.f32 0.6931472, %v591_v39 }
  0x9f   : > { %v251_v24 = vsel %vm247_vm13, 1.0, %v648_v63  ;;  %vm245_vm1 = vmand %vm240_vm12, %vm243_vm0  ;;  %v360_v35 = vmul.f32 %v356_v23, %v352_v15  ;;  %v304_v41 = vsub.f32 %v296_v40, %v300_v18  ;;  %v334_v40 = vsel %vm743_vm9, %v737_v57, %v328_v38 }
  0xa0   : > { %v366_v29 = vadd.f32 %v362_v17, %v350_v4  ;;  %v359_v36 = vsub.f32 1.0, %v251_v24  ;;  %v249_v42 = vsel %vm245_vm1, 1.0, %v648_v63  ;;  %v303_v46 = vmul.f32 %v251_v24, %v700_v9 }
  0xa1   : > { %v364_v45 = vadd.f32 %v360_v35, %v348_v34  ;;  %v351_v48 = vmul.f32 %v295_v11, %v251_v24  ;;  %v301_v51 = vmul.f32 %v249_v42, %v704_v13  ;;  %v357_v52 = vsub.f32 1.0, %v249_v42 }
  0xa2   : > { %v363_v49 = vmul.f32 %v359_v36, %v355_v26  ;;  %v370_v50 = vsub.f32 1.0, %v366_v29  ;;  %v384_v56 = vmul.f32 0.75, %v356_v23  ;;  %v349_v58 = vmul.f32 %v293_v28, %v249_v42 }
  0xa3   : > { %v368_v53 = vsub.f32 1.0, %v364_v45  ;;  %v361_v59 = vmul.f32 %v357_v52, %v353_v43  ;;  %v344_v62 = vadd.f32 %v316_v32, %v304_v41  ;;  %v307_v37 = vsub.f32 %v299_v47, %v303_v46 }
  0xa4   : > { %v367_v55 = vadd.f32 %v363_v49, %v351_v48  ;;  %v374_v2 = vmul.f32 %v370_v50, %v370_v50  ;;  %v305_v3 = vsub.f32 %v297_v54, %v301_v51  ;;  %v346_v7 = vadd.f32 %v334_v40, %v306_v25  ;;  %v396_v48 = vld [vmem:[#allocation2] sm:$0x1] }
  0xa5   : > { %v372_v6 = vmul.f32 %v368_v53, %v368_v53  ;;  %v365_v4 = vadd.f32 %v361_v59, %v349_v58  ;;  %v382_v57 = vmul.f32 0.25, %v749_v0  ;;  %v380_v61 = vmul.f32 0.25, %v248_v14 }
  0xa6   : > { %v371_v1 = vsub.f32 1.0, %v367_v55  ;;  %v325_v10 = vsel %vm767_vm14, %v322_v19, %v319_v8  ;;  %v385_v11 = vmul.f32 0.75, %v357_v52  ;;  %v386_v12 = vmul.f32 0.75, %v358_v5  ;;  %v423_v55 = vld [vmem:[#allocation3] sm:$0x1] }
  0xa7   : > { %v369_v15 = vsub.f32 1.0, %v365_v4  ;;  %v376_v47 = vmul.f32 %v372_v6, %v344_v62  ;;  %v388_v16 = vadd.f32 %v384_v56, %v380_v61  ;;  %v381_v17 = vmul.f32 0.25, %v249_v42 }
  0xa8   : > { %v375_v9 = vmul.f32 %v371_v1, %v371_v1  ;;  %v347_v18 = vadd.f32 %v343_v60, %v307_v37  ;;  %v345_v13 = vadd.f32 %v325_v10, %v305_v3  ;;  %v378_v21 = vmul.f32 %v374_v2, %v346_v7 }
  0xa9   : > { %v373_v54 = vmul.f32 %v369_v15, %v369_v15  ;;  %v387_v22 = vmul.f32 0.75, %v359_v36  ;;  %v383_v23 = vmul.f32 0.25, %v251_v24  ;;  %v389_v26 = vadd.f32 %v385_v11, %v381_v17 }
  0xaa   : > { %v379_v28 = vmul.f32 %v375_v9, %v347_v18  ;;  %v390_v20 = vadd.f32 %v386_v12, %v382_v57  ;;  %v392_v19 = vmul.f32 %v388_v16, %v376_v47  ;;  %v430_v51 = vshrl.u32 %v214_v30, 7 }
  0xab   : > { %v377_v14 = vmul.f32 %v373_v54, %v345_v13  ;;  %v391_v27 = vadd.f32 %v387_v22, %v383_v23  ;;  %v420_v52 = vstv %s636_s9 }
  0xac   : > { %v394_v0 = vmul.f32 %v390_v20, %v378_v21  ;;  %v397_v32 = vsel %vm243_vm0, %v392_v19, 0.0  ;;  %v431_v63 = vsub.s32 0, %v430_v51 }
  0xad   : > { %v393_v29 = vmul.f32 %v389_v26, %v377_v14  ;;  %v395_v5 = vmul.f32 %v391_v27, %v379_v28 }
  0xae   : > { %v399_v35 = vsel %vm243_vm0, %v394_v0, 0.0 }
  0xaf   : > { %v398_v33 = vsel %vm243_vm0, %v393_v29, 0.0  ;;  %v400_v36 = vsel %vm243_vm0, %v395_v5, 0.0  ;;  %vm421_vm0 = vcmp.eq.s32.totalorder %v714_v31, %v420_v52 }
  0xb0   : > { %v401_v34 = vadd.f32 %v398_v33, %v397_v32 }
  0xb2   : > { %v402_v24 = vadd.f32 %v401_v34, %v399_v35 }
  0xb4   : > { %v403_v38 = vadd.f32 %v402_v24, %v400_v36 }
  0xb6   : > { %404 = vadd.xlane.f32.xlu0 %v403_v38 }
 0x143   : > { %v405_v39 = vpop.xlane.xlu0 %404 }
 0x144   : > { %v406_v41 = vrot.slane %v405_v39, 4 }
 0x146   : > { %v407_v42 = vadd.f32 %v406_v41, %v405_v39 }
 0x148   : > { %v408_v43 = vrot.slane %v407_v42, 2 }
 0x14a   : > { %v409_v44 = vadd.f32 %v408_v43, %v407_v42 }
 0x14c   : > { %v410_v45 = vrot.slane %v409_v44, 1 }
 0x14e   : > { %v411_v46 = vadd.f32 %v410_v45, %v409_v44 }
 0x150   : > { %530 = vpush %v411_v46 }
 0x181   : > { %s531_s22 = spop %530 }
 0x182   : > { %v413_v49 = vstv %s531_s22 }
 0x183   : > { %v414_v25 = vadd.f32 %v413_v49, %v396_v48 }
 0x185   : > { %416 = vst.msk [vmem:[#allocation2] sm:$0x1] %vm204_vm2, %v414_v25 }
 0x18c   : > { %v422_v50 = vld [vmem:[#allocation2] sm:$0x1] }
 0x18d   : > { %426 = vperm.xlu1 %567, %v422_v50  }
 0x20c   : > { %v427_v53 = vpop.permute.xlu1 %426 }
 0x20d   : > { %v432_v8 = vrot.slane %v427_v53, %v431_v63 }
 0x20f   : > { %v433_v40 = vsel %vm421_vm0, %v432_v8, %v423_v55 }
 0x210   : > { %434 = vst [vmem:[#allocation3] sm:$0x1] %v433_v40 }
 0x211   : > { %605 = shalt.err (!%p602_p13)
}
 0x212   : > { %s606_s30 = scalar_lea.hbm %s857_s2, 16 }
 0x213   : > { %p607_p0 = scmp.ne.s32.totalorder %s857_s2, %s606_s30  ;;  %p612_p3 = scmp.lt.u32.totalorder %s606_s30, %s857_s2 }
 0x215   : > { %p608_p1 = pnand %p607_p0, %p820_p6 }
 0x217   : > { %p609_p2 = pneg %p608_p1 }
 0x219   : > { %p614_p4 = pnand %p612_p3, %p609_p2 }
 0x21b   : > { %617 = shalt.err (!%p614_p4)
}
 0x21c   : > { %533 = dma.vmem_to_hbm [thread:$0]  (%p820_p6), %s443_s24, 16, %s857_s2, [#allocation4]  }
 0x21d   : > { %631 = dma.done.wait (%p820_p6), [#allocation4], 16  }
 0x21e   : > { %633 = vsyncadd (%p820_p6), [#allocation4], 4294967280 }
 0x21f PF: > { %s13_s11 = sadd.s32 1, %s644_s11   ;;  %s867_s9 = smov %s640_s10 }
 0x220   : > { %p10_p5 = scmp.ge.s32.totalorder %s13_s11, 4   ;;  %s868_s10 = smov %s870_s13 }
 0x222   :  { %12 = sbr.rel (!%p10_p5) target bundleno = 2 (0x2), region = 70 }
 0x229   :  { %455 = vsyncpa [#allocation4], 1 }
 0x22a   :  { %457 = vsyncpa [#allocation4 + $0x1], 1 }

</bundles_post_ra>
